<compile_context>
chip_gen: v7x
topology: tpu7x:2x2x1
jax: 0.10.0
libtpu: 0.0.40
codegen_flags: <defaults>
</compile_context>

<pallas_src>
import jax
import jax.numpy as jnp
from jax.experimental import pallas as pl
from jax.experimental.pallas import tpu as pltpu


def _round_up(x, m):
    return (x + m - 1) // m * m


def _vmem_capacity_bytes():
    try:
        return int(pltpu.get_tpu_info().vmem_capacity_bytes)
    except Exception:
        return 64 * 1024 * 1024  # conservative: v7x per-TensorCore VMEM


def _head_kernel(x_ref, w1_ref, b1_ref, w2_ref, b2_ref, o_ref):
    # In-kernel cast of the x tile (VPU) — the wrapper never re-streams x.
    x = x_ref[...].astype(w1_ref.dtype)
    # dense: x @ w1  (MXU, f32 accumulation)
    h = jnp.dot(x, w1_ref[...], preferred_element_type=jnp.float32)
    # bias + tanh in f32 (VPU + EUP slots; correct on v5e, filler elsewhere)
    h = jnp.tanh(h + b1_ref[...])
    # dropout: identity at inference
    # out_proj: h @ w2 + b2  (MXU, f32 accumulation, lane-dense padded N)
    out = jnp.dot(h.astype(w2_ref.dtype), w2_ref[...],
                  preferred_element_type=jnp.float32)
    o_ref[...] = (out + b2_ref[...]).astype(o_ref.dtype)


def _plan_batch_tile(B, H, C_pad, x_item, w_item, o_item, block_b):
    """Pick the batch tile TB; returns (TB, vmem_estimate_bytes)."""

    def vmem_estimate(tb):
        return (2 * tb * H * x_item              # double-buffered x tiles
                + 2 * tb * C_pad * o_item        # double-buffered out tiles
                + (H * H + H * C_pad) * w_item   # VMEM-resident weights
                + (H + C_pad) * 4                # biases (f32)
                + tb * H * (4 + w_item)          # f32 h + compute-dtype copy
                + tb * C_pad * 4)                # f32 out intermediate

    if B <= block_b:
        # One tile, unless the batch is big enough that splitting it across
        # the two v7x TensorCores is worth the extra pipeline step.
        num_tiles = 2 if B >= 512 else 1
    else:
        num_tiles = pl.cdiv(B, block_b)
        if num_tiles % 2:
            num_tiles += 1        # even tile count: no one-step tail on one TC

    if num_tiles == 1:
        tb = B                    # full-dim block is always a legal block shape
    else:
        tb = _round_up(pl.cdiv(B, num_tiles), 16)   # 16: bf16 sublane packing

    # Shrink the tile if the VMEM plan would not fit comfortably on-chip.
    budget = int(0.6 * _vmem_capacity_bytes())
    while tb > 16 and vmem_estimate(tb) > budget:
        tb = max(16, _round_up(pl.cdiv(tb, 2), 16))

    return tb, vmem_estimate(tb)


def make_hubert_classification_head(w1, b1, w2, b2, *,
                                    compute_dtype=jnp.bfloat16,
                                    block_b=1024):
    """Builds the forward fn; casts/pads parameters exactly once.

    w1: (H, H); b1: (H,); w2: (H, C); b2: (C,).  Returned fn maps
    x: (B, H) -> (B, C).
    """
    H = w1.shape[0]
    C = w2.shape[1]
    C_pad = _round_up(C, 128)                       # lane-dense output tile

    w1c = jnp.asarray(w1).astype(compute_dtype)
    w2p = jnp.pad(jnp.asarray(w2), ((0, 0), (0, C_pad - C))).astype(compute_dtype)
    b1r = jnp.asarray(b1, dtype=jnp.float32).reshape(1, H)
    b2r = jnp.pad(jnp.asarray(b2, dtype=jnp.float32),
                  (0, C_pad - C)).reshape(1, C_pad)

    w_item = jnp.dtype(compute_dtype).itemsize

    def forward(x):
        B = x.shape[0]
        out_dtype = x.dtype
        x_item = jnp.dtype(x.dtype).itemsize
        o_item = jnp.dtype(out_dtype).itemsize

        # TODO(synk): for sub-tile batches (tiny B*H) a plain fused XLA matmul
        # beats any kernel launch; kept on the Pallas path here for the demo.

        TB, vmem_bytes = _plan_batch_tile(B, H, C_pad, x_item, w_item, o_item,
                                          block_b)
        grid = (pl.cdiv(B, TB),)

        vmem_limit = int(min(max(vmem_bytes + (8 << 20), 32 << 20),
                             int(0.8 * _vmem_capacity_bytes())))

        cost = pl.CostEstimate(
            flops=2 * B * H * (H + C_pad),
            transcendentals=B * H,
            bytes_accessed=(B * H * x_item
                            + (H * H + H * C_pad) * w_item
                            + (H + C_pad) * 4
                            + B * C_pad * o_item),
        )

        out = pl.pallas_call(
            _head_kernel,
            out_shape=jax.ShapeDtypeStruct((B, C_pad), out_dtype),
            grid=grid,
            in_specs=[
                pl.BlockSpec((TB, H), lambda i: (i, 0)),      # x tile (pipelined)
                pl.BlockSpec((H, H), lambda i: (0, 0)),       # w1 (VMEM-resident)
                pl.BlockSpec((1, H), lambda i: (0, 0)),       # b1
                pl.BlockSpec((H, C_pad), lambda i: (0, 0)),   # w2 (padded, resident)
                pl.BlockSpec((1, C_pad), lambda i: (0, 0)),   # b2 (padded)
            ],
            out_specs=pl.BlockSpec((TB, C_pad), lambda i: (i, 0)),
            compiler_params=pltpu.CompilerParams(
                dimension_semantics=("parallel",),
                vmem_limit_bytes=vmem_limit,
            ),
            cost_estimate=cost,
        )(x, w1c, b1r, w2p, b2r)

        return out[:, :C]

    return forward


if __name__ == "__main__":
    key = jax.random.PRNGKey(0)
    k_x, k_w1, k_b1, k_w2, k_b2, k_x2 = jax.random.split(key, 6)

    # Small shapes consistent with the module: batch=2, hidden=32, num_class=8
    B, H, C = 2, 32, 8
    x = jax.random.normal(k_x, (B, H), dtype=jnp.float32)
    # Deterministic synthetic parameters (nn.Linear-like scale)
    w1 = jax.random.normal(k_w1, (H, H), dtype=jnp.float32) * (1.0 / jnp.sqrt(H))
    b1 = jax.random.normal(k_b1, (H,), dtype=jnp.float32) * 0.01
    w2 = jax.random.normal(k_w2, (H, C), dtype=jnp.float32) * (1.0 / jnp.sqrt(H))
    b2 = jax.random.normal(k_b2, (C,), dtype=jnp.float32) * 0.01

    # Reference in plain JAX (dropout is identity at inference)
    ref = jnp.tanh(x @ w1 + b1) @ w2 + b2

    # f32 compute path: tight tolerance
    head_f32 = make_hubert_classification_head(w1, b1, w2, b2,
                                               compute_dtype=jnp.float32)
    out_f32 = jax.block_until_ready(head_f32(x))
    assert out_f32.shape == (B, C)
    assert jnp.allclose(out_f32, ref, atol=1e-5, rtol=1e-5)

    # bf16 MXU inputs with f32 accumulation: looser tolerance
    head_bf16 = jax.jit(make_hubert_classification_head(
        w1, b1, w2, b2, compute_dtype=jnp.bfloat16))
    out_bf16 = jax.block_until_ready(head_bf16(x))
    assert out_bf16.shape == (B, C)
    assert jnp.allclose(out_bf16, ref, atol=5e-2, rtol=5e-2)

    # A slightly larger batch exercising the 2-tile / ragged-last-block path
    # (two 272-row tiles covering 520 rows; last block is partially masked).
    B2 = 520
    x2 = jax.random.normal(k_x2, (B2, H), dtype=jnp.float32)
    ref2 = jnp.tanh(x2 @ w1 + b1) @ w2 + b2
    out2 = jax.block_until_ready(head_f32(x2))
    assert out2.shape == (B2, C)
    assert jnp.allclose(out2, ref2, atol=1e-5, rtol=1e-5)

    print("KERNEL_OK")
</pallas_src>

<mosaic_0001>
module attributes {stable_mosaic.version = 11 : i64} {
  func.func @_head_kernel(%arg0: i32, %arg1: memref<2x32xf32, #tpu.memory_space<vmem>>, %arg2: memref<32x32xf32, #tpu.memory_space<vmem>>, %arg3: memref<1x32xf32, #tpu.memory_space<vmem>>, %arg4: memref<32x128xf32, #tpu.memory_space<vmem>>, %arg5: memref<1x128xf32, #tpu.memory_space<vmem>>, %arg6: memref<2x128xf32, #tpu.memory_space<vmem>>) attributes {dimension_semantics = [#tpu.dimension_semantics<parallel>], iteration_bounds = array<i64: 1>, scalar_prefetch = 0 : i64, scratch_operands = 0 : i64, tpu.core_type = #tpu.core_type<tc>, window_params = [{transform_indices = @transform_0, window_bounds = array<i64: 2, 32>}, {pipeline_mode = #tpu.pipeline_mode<synchronous>, transform_indices = @transform_1, window_bounds = array<i64: 32, 32>}, {pipeline_mode = #tpu.pipeline_mode<synchronous>, transform_indices = @transform_2, window_bounds = array<i64: 1, 32>}, {pipeline_mode = #tpu.pipeline_mode<synchronous>, transform_indices = @transform_3, window_bounds = array<i64: 32, 128>}, {pipeline_mode = #tpu.pipeline_mode<synchronous>, transform_indices = @transform_4, window_bounds = array<i64: 1, 128>}, {transform_indices = @transform_5, window_bounds = array<i64: 2, 128>}]} {
    %c0 = arith.constant 0 : index
    %c0_0 = arith.constant 0 : index
    %0 = vector.load %arg1[%c0, %c0_0] : memref<2x32xf32, #tpu.memory_space<vmem>>, vector<2x32xf32>
    %c0_1 = arith.constant 0 : index
    %c0_2 = arith.constant 0 : index
    %1 = vector.load %arg2[%c0_1, %c0_2] : memref<32x32xf32, #tpu.memory_space<vmem>>, vector<32x32xf32>
    %cst = arith.constant dense<0.000000e+00> : vector<2x32xf32>
    %2 = tpu.matmul %0, %1, %cst {dimension_numbers = #tpu.dot_dimension_numbers<[1], [0], [0], [1], [0, 0, 1, 1], [], []>} : vector<2x32xf32>, vector<32x32xf32>, vector<2x32xf32> -> vector<2x32xf32>
    %c0_3 = arith.constant 0 : index
    %c0_4 = arith.constant 0 : index
    %3 = vector.load %arg3[%c0_3, %c0_4] : memref<1x32xf32, #tpu.memory_space<vmem>>, vector<1x32xf32>
    %4 = vector.broadcast %3 : vector<1x32xf32> to vector<2x32xf32>
    %5 = arith.addf %2, %4 : vector<2x32xf32>
    %6 = math.tanh %5 : vector<2x32xf32>
    %c0_5 = arith.constant 0 : index
    %c0_6 = arith.constant 0 : index
    %7 = vector.load %arg4[%c0_5, %c0_6] : memref<32x128xf32, #tpu.memory_space<vmem>>, vector<32x128xf32>
    %cst_7 = arith.constant dense<0.000000e+00> : vector<2x128xf32>
    %8 = tpu.matmul %6, %7, %cst_7 {dimension_numbers = #tpu.dot_dimension_numbers<[1], [0], [0], [1], [0, 0, 1, 1], [], []>} : vector<2x32xf32>, vector<32x128xf32>, vector<2x128xf32> -> vector<2x128xf32>
    %c0_8 = arith.constant 0 : index
    %c0_9 = arith.constant 0 : index
    %9 = vector.load %arg5[%c0_8, %c0_9] : memref<1x128xf32, #tpu.memory_space<vmem>>, vector<1x128xf32>
    %10 = vector.broadcast %9 : vector<1x128xf32> to vector<2x128xf32>
    %11 = arith.addf %8, %10 : vector<2x128xf32>
    %c0_10 = arith.constant 0 : index
    %c0_11 = arith.constant 0 : index
    %12 = vector.load %arg6[%c0_10, %c0_11] : memref<2x128xf32, #tpu.memory_space<vmem>>, vector<2x128xf32>
    tpu.vector_store %arg6[%c0_10, %c0_11], %11 {strides = array<i32>} : memref<2x128xf32, #tpu.memory_space<vmem>>, vector<2x128xf32>,
    return
  }
  func.func @transform_0(%arg0: i32) -> (i32, i32) {
    %c0_i32 = arith.constant 0 : i32
    %c0_i32_0 = arith.constant 0 : i32
    return %arg0, %c0_i32 : i32, i32
  }
  func.func @transform_1(%arg0: i32) -> (i32, i32) {
    %c0_i32 = arith.constant 0 : i32
    %c0_i32_0 = arith.constant 0 : i32
    %c0_i32_1 = arith.constant 0 : i32
    return %c0_i32, %c0_i32_0 : i32, i32
  }
  func.func @transform_2(%arg0: i32) -> (i32, i32) {
    %c0_i32 = arith.constant 0 : i32
    %c0_i32_0 = arith.constant 0 : i32
    %c0_i32_1 = arith.constant 0 : i32
    return %c0_i32, %c0_i32_0 : i32, i32
  }
  func.func @transform_3(%arg0: i32) -> (i32, i32) {
    %c0_i32 = arith.constant 0 : i32
    %c0_i32_0 = arith.constant 0 : i32
    %c0_i32_1 = arith.constant 0 : i32
    return %c0_i32, %c0_i32_0 : i32, i32
  }
  func.func @transform_4(%arg0: i32) -> (i32, i32) {
    %c0_i32 = arith.constant 0 : i32
    %c0_i32_0 = arith.constant 0 : i32
    %c0_i32_1 = arith.constant 0 : i32
    return %c0_i32, %c0_i32_0 : i32, i32
  }
  func.func @transform_5(%arg0: i32) -> (i32, i32) {
    %c0_i32 = arith.constant 0 : i32
    %c0_i32_0 = arith.constant 0 : i32
    return %arg0, %c0_i32 : i32, i32
  }
}

</mosaic_0001>

<bundles_post_ra>
// kernel: tpu_custom_call.1
= control target key start
LH: loop header
LB: loop body
LE: loop exit
PB: predicated region body
PF: predicated region fallthrough
CT: control target
= control target key end

     0   :  { %10 = vsyncpa [#allocation3], 0  ;;  %s502_s0 = inlined_call_operand.hbm [shape: f32[2,32], index: 0, kind: input, shape index: {}]   ;;  %s503_s1 = inlined_call_operand.hbm [shape: f32[32,32], index: 1, kind: input, shape index: {}]   ;;  %s504_s2 = inlined_call_operand.vmem [shape: f32[1,32], index: 2, kind: input, shape index: {}]   ;;  %s505_s3 = inlined_call_operand.hbm [shape: f32[32,128], index: 3, kind: input, shape index: {}]   ;;  %s506_s4 = inlined_call_operand.vmem [shape: f32[1,128], index: 4, kind: input, shape index: {}]   ;;  %s507_s5 = inlined_call_operand.hbm [shape: f32[2,128], index: 5, kind: output, shape index: {}]  }
   0x1   :  { %11 = vsyncpa [#allocation6], 0 }
   0x2   :  { %12 = vsyncpa [#allocation4], 0  ;;  %s401_s18 = smov [#allocation5]   ;;  %s307_s22 = scalar_lea.hbm %s503_s1, 512 }
   0x3   :  { %s28_s19 = sshll.u32 %s401_s18, 4  ;;  %p308_p0 = scmp.ne.s32.totalorder %s503_s1, %s307_s22  ;;  %s29_s19 = int_to_ptr.vmem [resolvable:$true] %s28_s19 }
   0x4   :  { %p311_p1 = scmp.lt.u32.totalorder %s307_s22, %s503_s1 }
   0x6   :  { %p313_p2 = pnand %p311_p1, %p308_p0 }
   0x8   :  { %316 = shalt.err (!%p313_p2)
}
   0x9   :  { %s317_s27 = scalar_lea.vmem %s29_s19, 512  ;;  %p322_p4 = scmp.lt.s32.totalorder %s29_s19, %s29_s19 }
   0xa   :  { %p318_p3 = scmp.ne.s32.totalorder %s29_s19, %s317_s27  ;;  %p323_p5 = scmp.lt.s32.totalorder %s317_s27, %s317_s27 }
   0xc   :  { %p324_p6 = por %p323_p5, %p322_p4 }
   0xe   :  { %p325_p7 = pnand %p324_p6, %p318_p3 }
  0x10   :  { %328 = shalt.err (!%p325_p7)
}
  0x11   :  { %s402_s28 = smov 128   ;;  %s403_s29 = smov 8  }
  0x12   :  { %34 = dma.hbm_to_vmem [thread:$0]  %s503_s1, 512, %s29_s19, [#allocation6], %s402_s28, %s402_s28, %s403_s29  }
  0x13   :  { %s404_s7 = smov [#allocation2]   ;;  %s405_s9 = smov [#allocation7]  }
  0x14   :  { %s19_s8 = sshll.u32 %s404_s7, 4  ;;  %s42_s10 = sshll.u32 %s405_s9, 4  ;;  %s20_s8 = int_to_ptr.vmem [resolvable:$true] %s19_s8  ;;  %s43_s10 = int_to_ptr.vmem [resolvable:$true] %s42_s10 }
  0x15   :  { %s329_s13 = scalar_lea.hbm %s502_s0, 32 }
  0x16   :  { %p330_p8 = scmp.ne.s32.totalorder %s502_s0, %s329_s13  ;;  %p333_p9 = scmp.lt.u32.totalorder %s329_s13, %s502_s0 }
  0x18   :  { %p335_p10 = pnand %p333_p9, %p330_p8 }
  0x1a   :  { %338 = shalt.err (!%p335_p10)
}
  0x1b   :  { %s339_s1 = scalar_lea.vmem %s20_s8, 32  ;;  %p344_p12 = scmp.lt.s32.totalorder %s20_s8, %s20_s8 }
  0x1c   :  { %p340_p11 = scmp.ne.s32.totalorder %s20_s8, %s339_s1  ;;  %p345_p13 = scmp.lt.s32.totalorder %s339_s1, %s339_s1 }
  0x1e   :  { %p346_p0 = por %p345_p13, %p344_p12 }
  0x20   :  { %p347_p1 = pnand %p346_p0, %p340_p11 }
  0x22   :  { %350 = shalt.err (!%p347_p1)
}
  0x23   :  { %22 = dma.hbm_to_vmem [thread:$0]  %s502_s0, 32, %s20_s8, [#allocation3]  }
  0x24   :  { %s351_s22 = scalar_lea.hbm %s505_s3, 512 }
  0x25   :  { %p352_p2 = scmp.ne.s32.totalorder %s505_s3, %s351_s22  ;;  %p355_p3 = scmp.lt.u32.totalorder %s351_s22, %s505_s3 }
  0x27   :  { %p357_p4 = pnand %p355_p3, %p352_p2 }
  0x29   :  { %360 = shalt.err (!%p357_p4)
}
  0x2a   :  { %s361_s27 = scalar_lea.vmem %s43_s10, 512  ;;  %p366_p6 = scmp.lt.s32.totalorder %s43_s10, %s43_s10 }
  0x2b   :  { %p362_p5 = scmp.ne.s32.totalorder %s43_s10, %s361_s27  ;;  %p367_p7 = scmp.lt.s32.totalorder %s361_s27, %s361_s27 }
  0x2d   :  { %p368_p8 = por %p367_p7, %p366_p6 }
  0x2f   :  { %p369_p9 = pnand %p368_p8, %p362_p5 }
  0x31   :  { %372 = shalt.err (!%p369_p9)
}
  0x32   :  { %48 = dma.hbm_to_vmem [thread:$0]  %s505_s3, 512, %s43_s10, [#allocation6], %s402_s28, %s402_s28, %s403_s29  }
  0x33   :  { %395 = dma.done.wait [#allocation3], 32  }
  0x34   :  { %396 = vsyncadd [#allocation3], 4294967264 }
  0x35   :  { %397 = dma.done.wait [#allocation6], 1024  }
  0x36   :  { %398 = vsyncadd [#allocation6], 4294966272  ;;  %v406_v0 = vmov 0.0|0.0   ;;  %vm407_vm0 = vmmov 0   ;;  %v408_v1 = vmov 0.0   ;;  %v61_v2 = vld [vmem:[#allocation5] sm:$0xff] }
  0x37   :  { %284 = vmatprep.subr.bf16.mxu0 %v406_v0  ;;  %270 = vmatprep.mubr.msk.f32.mxu0 %vm407_vm0, %v408_v1  ;;  %v62_v3 = vld [vmem:[#allocation5 + $0x8] sm:$0xff]  ;;  %v63_v4 = vld [vmem:[#allocation5 + $0x10] sm:$0xff]  ;;  %v64_v6 = vld [vmem:[#allocation5 + $0x18] sm:$0xff]  ;;  %vm72_vm1 = vcmask 261120   ;;  %s409_s7 = smov [#allocation8]  }
  0x38   :  { %290 = vmatprep.subr.bf16.mxu1 %v406_v0  ;;  %281 = vmatprep.mubr.msk.f32.mxu1 %vm407_vm0, %v408_v1  ;;  %v285_v5 = vpack.c.bf16 %v62_v3, %v61_v2  ;;  %v288_v7 = vpack.c.bf16 %v64_v6, %v63_v4  ;;  %v60_v8 = vld [vmem:[#allocation2] sm:$0x3]  ;;  %v147_v9 = vld [vmem:[#allocation7] sm:$0xff]  ;;  %v148_v10 = vld [vmem:[#allocation7 + $0x8] sm:$0xff]  ;;  %s238_s8 = sshll.u32 %s409_s7, 4  ;;  %s239_s8 = int_to_ptr.vmem [resolvable:$true] %s238_s8 }
  0x39   :  { %v149_v11 = vld [vmem:[#allocation7 + $0x10] sm:$0xff]  ;;  %v291_v12 = vpack.c.bf16 %v148_v10, %v147_v9  ;;  %v150_v13 = vld [vmem:[#allocation7 + $0x18] sm:$0xff]  ;;  %s373_s9 = scalar_lea.vmem %s239_s8, 32  ;;  %p378_p11 = scmp.lt.s32.totalorder %s239_s8, %s239_s8 }
  0x3a   :  { %286 = vmatpush3.bf16.msra.mxu0 %v285_v5  ;;  %v294_v14 = vpack.c.bf16 %v150_v13, %v149_v11  ;;  %v248_v15 = vld [vmem:[%s504_s2] ss:$0 sm:$0xff]  ;;  %p374_p10 = scmp.ne.s32.totalorder %s239_s8, %s373_s9  ;;  %p379_p12 = scmp.lt.s32.totalorder %s373_s9, %s373_s9 }
  0x3b   :  { %287 = vmatprep.subr.bf16.mxu0 %v406_v0  ;;  %292 = vmatpush3.bf16.msra.mxu1 %v291_v12  ;;  %v250_v20 = vld [vmem:[%s506_s4] ss:$0 sm:$0xff] }
  0x3c   :  { %293 = vmatprep.subr.bf16.mxu1 %v406_v0  ;;  %p380_p13 = por %p379_p12, %p378_p11 }
  0x3e   :  { %289 = vmatpush3.bf16.msra.mxu0 %v288_v7  ;;  %p381_p0 = pnand %p380_p13, %p374_p10 }
  0x3f   :  { %295 = vmatpush3.bf16.msra.mxu1 %v294_v14 }
  0x41   :  { %271 = vmatmul.mubr.msk.f32.vlgmr.msra.gmra.mrb[0].mxu0 %vm72_vm1, %v60_v8 }
 0x114   :  { %v142_v16 = vpop.f32.mrb[0].mxu0 }
 0x115   :  { %v143_v17 = vadd.f32 %v248_v15, %v142_v16  ;;  %v272_v18 = vpop.f32.mrb[1].mxu0 }
 0x117   :  { %305 = vtanh.f32 %v143_v17 }
 0x121   :  { %v306_v19 = vpop.eup %305 }
 0x122   :  { %282 = vmatmul.mubr.msk.f32.vlgmr.msra.gmra.mrb[0].mxu1 %vm72_vm1, %v306_v19 }
 0x1f5   :  { %v227_v21 = vpop.f32.mrb[0].mxu1 }
 0x1f6   :  { %v228_v22 = vadd.f32 %v250_v20, %v227_v21  ;;  %v283_v23 = vpop.f32.mrb[1].mxu1 }
 0x1f8   :  { %231 = vst [vmem:[#allocation8] sm:$0x3] %v228_v22 }
 0x1f9   :  { %384 = shalt.err (!%p381_p0)
}
 0x1fa   :  { %s385_s11 = scalar_lea.hbm %s507_s5, 32 }
 0x1fb   :  { %p386_p1 = scmp.ne.s32.totalorder %s507_s5, %s385_s11  ;;  %p389_p2 = scmp.lt.u32.totalorder %s385_s11, %s507_s5 }
 0x1fd   :  { %p391_p3 = pnand %p389_p2, %p386_p1 }
 0x1ff   :  { %394 = shalt.err (!%p391_p3)
}
 0x200   :  { %241 = dma.vmem_to_hbm [thread:$0]  %s239_s8, 32, %s507_s5, [#allocation4]  }
 0x201   :  { %399 = dma.done.wait [#allocation4], 32  }
 0x202   :  { %400 = vsyncadd [#allocation4], 4294967264 }
 0x203   :  { %245 = vsyncpa [#allocation3], 1 }
 0x204   :  { %246 = vsyncpa [#allocation6], 1 }
 0x205   :  { %247 = vsyncpa [#allocation4], 1 }

</bundles_post_ra>
